<compile_context>
chip_gen: v6e
topology: v6e:2x2x1
jax: 0.10.0
libtpu: 0.0.40
codegen_flags: <defaults>
</compile_context>

<pallas_src>
import functools

import jax
import jax.numpy as jnp
from jax.experimental import pallas as pl
from jax.experimental.pallas import tpu as pltpu

EPS = 1e-8  # RMSNorm eps


def _round_up(x, m):
    return ((x + m - 1) // m) * m


def _vmem_capacity_bytes():
    """Physical per-core VMEM; conservative fallback = v7x's 64 MiB."""
    try:
        cap = getattr(pltpu.get_tpu_info(), "vmem_capacity_bytes", None)
        if cap:
            return int(cap)
    except Exception:
        pass
    return 64 << 20


def _footprint_bytes(tile_m, tile_n, d_pad, x_item, out_item, w_item):
    """Pessimistic per-call VMEM estimate (assumes double-buffered weight)."""
    f = 2 * tile_m * d_pad * x_item          # x rows (double buffered)
    f += 2 * tile_m * tile_n * out_item      # output tile (double buffered)
    f += 2 * d_pad * tile_n * w_item         # weight tile
    f += tile_m * d_pad * w_item             # x_normed cache scratch
    f += 2 * tile_m * d_pad * 4              # f32 temporaries in the norm
    f += tile_m * tile_n * 4                 # f32 matmul accumulator
    f += 8 * d_pad * 4                       # scale / bias (+ buffers)
    return f


def _pick_tile_m(m):
    """Largest row tile (multiple of 8) keeping padded rows <= ~12.5% of M."""
    cands = (512, 256, 128, 64, 32, 16, 8)
    for c in cands:
        if _round_up(m, c) - m <= m * 0.125:
            return c
    # nothing within tolerance -> minimize padding (ties -> larger tile)
    return min(cands, key=lambda c: (_round_up(m, c) - m, -c))


def _choose_tiles(m, d_pad, x_item, out_item, w_item, design_budget):
    """Pick (tile_m, tile_n) fitting design_budget; prefer gn==1 (weight resident)."""
    step = 256 if d_pad % 256 == 0 else 128   # MXU-width friendly N tiles
    tm = _pick_tile_m(m)
    while True:
        if _footprint_bytes(tm, d_pad, d_pad, x_item, out_item, w_item) <= design_budget:
            return tm, d_pad                  # weight fully resident (gn == 1)
        for tn in range(d_pad - step, step - 1, -step):
            if d_pad % tn == 0 and \
               _footprint_bytes(tm, tn, d_pad, x_item, out_item, w_item) <= design_budget:
                return tm, tn
        if tm <= 8:
            return tm, step                   # best effort (vmem_limit clamped anyway)
        tm = max(8, tm // 2)


def prenorm_add_kernel(x_ref, scale_ref, w_ref, b_ref, o_ref, xn_ref, *,
                       d_model, tile_n, gn):
    """x_ref: (TM, Dp) full feature rows; w_ref: (Dp, TN); o_ref: (TM, TN);
    xn_ref: (TM, Dp) VMEM cache of the normalized rows (in matmul dtype)."""
    j = pl.program_id(1)

    # --- RMSNorm (p < 0: full-width L2 norm, bias=False) --------------------
    # Computed once per row tile (j == 0) and cached; reused for every column
    # tile j > 0 (removes the redundant VPU/XLU/sqrt work per weight tile).
    @pl.when(j == 0)
    def _():
        x = x_ref[...].astype(jnp.float32)
        ssq = jnp.sum(x * x, axis=-1, keepdims=True)       # padded lanes are zero
        rms = jnp.sqrt(ssq) * (d_model ** -0.5)            # RMS over ORIGINAL d_model
        # Exact divide to match x / (rms + eps) of the reference (also keeps padded
        # all-zero rows finite); only (TM, 1) scalars, so the cost is negligible.
        inv = pl.reciprocal(rms + EPS)
        xn = (x * inv) * scale_ref[...].astype(jnp.float32)
        xn_ref[...] = xn.astype(xn_ref.dtype)

    # --- sublayer: Linear column tile  y = x_normed @ W[:, j*TN:(j+1)*TN] + b ---
    y = jnp.dot(xn_ref[...], w_ref[...], preferred_element_type=jnp.float32)
    y = y + b_ref[...].astype(jnp.float32)

    # --- residual add with the ORIGINAL (un-normed) input, same column tile ---
    if gn == 1:
        x_res = x_ref[...].astype(jnp.float32)
    else:
        col0 = pl.multiple_of(j * tile_n, 128)
        x_res = x_ref[:, pl.ds(col0, tile_n)].astype(jnp.float32)

    o_ref[...] = (x_res + y).astype(o_ref.dtype)


def prepare_params(scale, w_out_in, b, *, matmul_dtype=jnp.float32):
    """Hoisted, once-per-model parameter prep: transpose + pad + cast the Linear
    weight and pad scale/bias.  Doing this per call costs a full D^2 HBM round
    trip (plus a transpose) — pure overhead for static inference parameters."""
    d_model = w_out_in.shape[0]
    d_pad = _round_up(d_model, 128)
    scale_p = jnp.pad(scale, (0, d_pad - d_model)).reshape(1, d_pad).astype(jnp.float32)
    # kernel consumes (D_in, D_out) so y = x_normed @ W
    w_p = jnp.pad(w_out_in.T, ((0, d_pad - d_model), (0, d_pad - d_model))).astype(matmul_dtype)
    b_p = jnp.pad(b, (0, d_pad - d_model)).reshape(1, d_pad).astype(jnp.float32)
    return {"scale": scale_p, "w": w_p, "b": b_p,
            "d_model": d_model, "d_pad": d_pad,
            "matmul_dtype": jnp.dtype(matmul_dtype)}


def semantic_prenorm_and_add_prepared(x, params, *, tile_m=None, tile_n=None):
    """x: (B, S, D); params: output of prepare_params()."""
    B, S, D = x.shape
    assert D == params["d_model"]
    d_pad = params["d_pad"]
    matmul_dtype = params["matmul_dtype"]
    out_dtype = x.dtype
    M = B * S

    x_item = jnp.dtype(x.dtype).itemsize
    out_item = jnp.dtype(out_dtype).itemsize
    w_item = matmul_dtype.itemsize

    vmem_cap = _vmem_capacity_bytes()
    hard_limit = int(vmem_cap * 0.85)     # never request ~100% of physical VMEM (v7x!)
    design_budget = int(vmem_cap * 0.70)  # headroom for compiler scratch / semaphores

    auto_tm, auto_tn = _choose_tiles(M, d_pad, x_item, out_item, w_item, design_budget)
    tile_m = auto_tm if tile_m is None else tile_m
    tile_n = auto_tn if tile_n is None else tile_n
    assert tile_m % 8 == 0 and tile_n % 128 == 0 and d_pad % tile_n == 0

    M_pad = _round_up(M, tile_m)
    gm, gn = M_pad // tile_m, d_pad // tile_n

    # Pad activations: rows to the tile, features to a lane-dense multiple of 128.
    x2 = jnp.pad(x.reshape(M, D), ((0, M_pad - M), (0, d_pad - D)))

    kernel = functools.partial(prenorm_add_kernel, d_model=D, tile_n=tile_n, gn=gn)

    footprint = _footprint_bytes(tile_m, tile_n, d_pad, x_item, out_item, w_item)
    vmem_limit = min(hard_limit, max(int(footprint * 1.4), 32 << 20))

    cost = pl.CostEstimate(
        flops=2 * M_pad * d_pad * d_pad + 8 * M_pad * d_pad,
        transcendentals=M_pad,
        bytes_accessed=(M_pad * d_pad * x_item
                        + d_pad * d_pad * w_item * (gm if gn > 1 else 1)
                        + M_pad * d_pad * out_item))

    def run(single_buffer_invariants):
        def spec(shape, index_map, invariant=False):
            if single_buffer_invariants and invariant:
                # grid-invariant operand: a second pipeline buffer is pure VMEM waste
                return pl.BlockSpec(shape, index_map, pipeline_mode=pl.Buffered(1))
            return pl.BlockSpec(shape, index_map)

        return pl.pallas_call(
            kernel,
            out_shape=jax.ShapeDtypeStruct((M_pad, d_pad), out_dtype),
            grid=(gm, gn),
            in_specs=[
                pl.BlockSpec((tile_m, d_pad), lambda i, j: (i, 0)),              # x rows
                spec((1, d_pad), lambda i, j: (0, 0), invariant=True),           # RMS scale
                spec((d_pad, tile_n), lambda i, j: (0, j), invariant=(gn == 1)), # weight
                spec((1, tile_n), lambda i, j: (0, j), invariant=(gn == 1)),     # bias
            ],
            out_specs=pl.BlockSpec((tile_m, tile_n), lambda i, j: (i, j)),
            scratch_shapes=[pltpu.VMEM((tile_m, d_pad), matmul_dtype)],          # norm cache
            compiler_params=pltpu.CompilerParams(
                # j is a reuse axis (x block + norm cache): walk it sequentially;
                # megacore (v7x) shards over rows instead.
                dimension_semantics=("parallel", "arbitrary"),
                vmem_limit_bytes=vmem_limit),
            cost_estimate=cost,
        )(x2, params["scale"], params["w"], params["b"])

    try:
        out = run(single_buffer_invariants=True)
    except (TypeError, NotImplementedError):
        # pipeline_mode=pl.Buffered unsupported on this jax version -> default
        # double-buffering (identical numerics; footprint already budgeted for it).
        out = run(single_buffer_invariants=False)

    return out[:M, :D].reshape(B, S, D)


def semantic_prenorm_and_add(x, scale, w_out_in, b, *, matmul_dtype=None,
                             tile_m=None, tile_n=None):
    """Convenience one-shot wrapper (params prepared per call).  For repeated
    inference, call prepare_params() once and use semantic_prenorm_and_add_prepared.
    matmul_dtype=jnp.bfloat16 enables bf16-input / f32-accumulate MXU matmuls
    (3-6x faster than emulated f32 matmul) at slightly relaxed accuracy."""
    if matmul_dtype is None:
        matmul_dtype = jnp.bfloat16 if x.dtype == jnp.bfloat16 else jnp.float32
    params = prepare_params(scale, w_out_in, b, matmul_dtype=matmul_dtype)
    return semantic_prenorm_and_add_prepared(x, params, tile_m=tile_m, tile_n=tile_n)


def reference(x, scale, w_out_in, b):
    xf = x.astype(jnp.float32)
    norm = jnp.linalg.norm(xf, axis=-1, keepdims=True)
    rms = norm * (x.shape[-1] ** -0.5)
    xn = (xf / (rms + EPS)) * scale
    y = xn @ w_out_in.astype(jnp.float32).T + b
    return (xf + y).astype(x.dtype)


if __name__ == "__main__":
    key = jax.random.PRNGKey(0)
    kx, kw, kb, kx2, kw2, kb2 = jax.random.split(key, 6)

    # --- test 1: module-sized shapes (B=2, S=8, D=32), f32, gn == 1 ---------------
    B, S, D = 2, 8, 32
    x = jax.random.normal(kx, (B, S, D), dtype=jnp.float32)
    scale = jnp.ones((D,), dtype=jnp.float32)                            # RMSNorm.scale = ones
    w = jax.random.normal(kw, (D, D), dtype=jnp.float32) * (D ** -0.5)   # Linear.weight (out, in)
    b = jax.random.normal(kb, (D,), dtype=jnp.float32) * 0.01            # Linear.bias

    params = prepare_params(scale, w, b, matmul_dtype=jnp.float32)       # hoisted param prep
    out = jax.block_until_ready(semantic_prenorm_and_add_prepared(x, params))
    ref = reference(x, scale, w, b)
    assert out.shape == (B, S, D)
    assert jnp.allclose(out, ref, atol=1e-4, rtol=1e-4), "mismatch vs reference (f32)"

    # --- test 2: gn > 1 + padded rows (norm cache reused across column tiles) -----
    B2, S2, D2 = 2, 13, 256
    x2 = jax.random.normal(kx2, (B2, S2, D2), dtype=jnp.float32)
    scale2 = jnp.ones((D2,), dtype=jnp.float32)
    w2 = jax.random.normal(kw2, (D2, D2), dtype=jnp.float32) * (D2 ** -0.5)
    b2 = jax.random.normal(kb2, (D2,), dtype=jnp.float32) * 0.01
    out2 = jax.block_until_ready(
        semantic_prenorm_and_add(x2, scale2, w2, b2, tile_m=8, tile_n=128))
    ref2 = reference(x2, scale2, w2, b2)
    assert jnp.allclose(out2, ref2, atol=1e-4, rtol=1e-4), "mismatch vs reference (gn>1)"

    # --- test 3: bf16-input MXU path (f32 accumulate), relaxed tolerance ----------
    out3 = jax.block_until_ready(
        semantic_prenorm_and_add(x2, scale2, w2, b2, matmul_dtype=jnp.bfloat16))
    assert jnp.allclose(out3, ref2, atol=5e-2, rtol=5e-2), "mismatch vs reference (bf16)"

    print("KERNEL_OK")
</pallas_src>

<mosaic_0001>
module attributes {stable_mosaic.version = 11 : i64} {
  func.func @prenorm_add_kernel(%arg0: i32, %arg1: i32, %arg2: memref<16x128xf32, #tpu.memory_space<vmem>>, %arg3: memref<1x128xf32, #tpu.memory_space<vmem>>, %arg4: memref<128x128xf32, #tpu.memory_space<vmem>>, %arg5: memref<1x128xf32, #tpu.memory_space<vmem>>, %arg6: memref<16x128xf32, #tpu.memory_space<vmem>>, %arg7: memref<16x128xf32, #tpu.memory_space<vmem>>) attributes {dimension_semantics = [#tpu.dimension_semantics<parallel>, #tpu.dimension_semantics<arbitrary>], iteration_bounds = array<i64: 1, 1>, scalar_prefetch = 0 : i64, scratch_operands = 1 : i64, tpu.core_type = #tpu.core_type<tc>, window_params = [{transform_indices = @transform_0, window_bounds = array<i64: 16, 128>}, {pipeline_mode = #tpu.pipeline_mode<synchronous>, transform_indices = @transform_1, window_bounds = array<i64: 1, 128>}, {pipeline_mode = #tpu.pipeline_mode<synchronous>, transform_indices = @transform_2, window_bounds = array<i64: 128, 128>}, {pipeline_mode = #tpu.pipeline_mode<synchronous>, transform_indices = @transform_3, window_bounds = array<i64: 1, 128>}, {transform_indices = @transform_4, window_bounds = array<i64: 16, 128>}]} {
    %c0_i32 = arith.constant 0 : i32
    %0 = arith.cmpi eq, %arg1, %c0_i32 : i32
    %1 = arith.extui %0 : i1 to i32
    %c0_i32_0 = arith.constant 0 : i32
    %2 = arith.cmpi ne, %1, %c0_i32_0 : i32
    scf.if %2 {
      %c0_10 = arith.constant 0 : index
      %c0_11 = arith.constant 0 : index
      %12 = vector.load %arg2[%c0_10, %c0_11] : memref<16x128xf32, #tpu.memory_space<vmem>>, vector<16x128xf32>
      %13 = arith.mulf %12, %12 : vector<16x128xf32>
      %cst_12 = arith.constant dense<0.000000e+00> : vector<16xf32>
      %14 = vector.multi_reduction <add>, %13, %cst_12 [1] : vector<16x128xf32> to vector<16xf32>
      %15 = vector.shape_cast %14 : vector<16xf32> to vector<16x1xf32>
      %16 = math.sqrt %15 : vector<16x1xf32>
      %cst_13 = arith.constant 0.176776692 : f32
      %17 = vector.broadcast %cst_13 : f32 to vector<16x1xf32>
      %18 = arith.mulf %16, %17 : vector<16x1xf32>
      %cst_14 = arith.constant 9.99999993E-9 : f32
      %19 = vector.broadcast %cst_14 : f32 to vector<16x1xf32>
      %20 = arith.addf %18, %19 : vector<16x1xf32>
      %21 = tpu.reciprocal %20 : vector<16x1xf32> -> vector<16x1xf32>
      %22 = vector.broadcast %21 : vector<16x1xf32> to vector<16x128xf32>
      %23 = arith.mulf %12, %22 : vector<16x128xf32>
      %c0_15 = arith.constant 0 : index
      %c0_16 = arith.constant 0 : index
      %24 = vector.load %arg3[%c0_15, %c0_16] : memref<1x128xf32, #tpu.memory_space<vmem>>, vector<1x128xf32>
      %25 = vector.broadcast %24 : vector<1x128xf32> to vector<16x128xf32>
      %26 = arith.mulf %23, %25 : vector<16x128xf32>
      %c0_17 = arith.constant 0 : index
      %c0_18 = arith.constant 0 : index
      %27 = vector.load %arg7[%c0_17, %c0_18] : memref<16x128xf32, #tpu.memory_space<vmem>>, vector<16x128xf32>
      tpu.vector_store %arg7[%c0_17, %c0_18], %26 {strides = array<i32>} : memref<16x128xf32, #tpu.memory_space<vmem>>, vector<16x128xf32>,
    } else {
    }
    %c0 = arith.constant 0 : index
    %c0_1 = arith.constant 0 : index
    %3 = vector.load %arg7[%c0, %c0_1] : memref<16x128xf32, #tpu.memory_space<vmem>>, vector<16x128xf32>
    %c0_2 = arith.constant 0 : index
    %c0_3 = arith.constant 0 : index
    %4 = vector.load %arg4[%c0_2, %c0_3] : memref<128x128xf32, #tpu.memory_space<vmem>>, vector<128x128xf32>
    %cst = arith.constant dense<0.000000e+00> : vector<16x128xf32>
    %5 = tpu.matmul %3, %4, %cst {dimension_numbers = #tpu.dot_dimension_numbers<[1], [0], [0], [1], [0, 0, 1, 1], [], []>} : vector<16x128xf32>, vector<128x128xf32>, vector<16x128xf32> -> vector<16x128xf32>
    %c0_4 = arith.constant 0 : index
    %c0_5 = arith.constant 0 : index
    %6 = vector.load %arg5[%c0_4, %c0_5] : memref<1x128xf32, #tpu.memory_space<vmem>>, vector<1x128xf32>
    %7 = vector.broadcast %6 : vector<1x128xf32> to vector<16x128xf32>
    %8 = arith.addf %5, %7 : vector<16x128xf32>
    %c0_6 = arith.constant 0 : index
    %c0_7 = arith.constant 0 : index
    %9 = vector.load %arg2[%c0_6, %c0_7] : memref<16x128xf32, #tpu.memory_space<vmem>>, vector<16x128xf32>
    %10 = arith.addf %9, %8 : vector<16x128xf32>
    %c0_8 = arith.constant 0 : index
    %c0_9 = arith.constant 0 : index
    %11 = vector.load %arg6[%c0_8, %c0_9] : memref<16x128xf32, #tpu.memory_space<vmem>>, vector<16x128xf32>
    tpu.vector_store %arg6[%c0_8, %c0_9], %10 {strides = array<i32>} : memref<16x128xf32, #tpu.memory_space<vmem>>, vector<16x128xf32>,
    return
  }
  func.func @transform_0(%arg0: i32, %arg1: i32) -> (i32, i32) {
    %c0_i32 = arith.constant 0 : i32
    %c0_i32_0 = arith.constant 0 : i32
    return %arg0, %c0_i32 : i32, i32
  }
  func.func @transform_1(%arg0: i32, %arg1: i32) -> (i32, i32) {
    %c0_i32 = arith.constant 0 : i32
    %c0_i32_0 = arith.constant 0 : i32
    %c0_i32_1 = arith.constant 0 : i32
    return %c0_i32, %c0_i32_0 : i32, i32
  }
  func.func @transform_2(%arg0: i32, %arg1: i32) -> (i32, i32) {
    %c0_i32 = arith.constant 0 : i32
    %c0_i32_0 = arith.constant 0 : i32
    return %c0_i32, %arg1 : i32, i32
  }
  func.func @transform_3(%arg0: i32, %arg1: i32) -> (i32, i32) {
    %c0_i32 = arith.constant 0 : i32
    %c0_i32_0 = arith.constant 0 : i32
    return %c0_i32, %arg1 : i32, i32
  }
  func.func @transform_4(%arg0: i32, %arg1: i32) -> (i32, i32) {
    %c0_i32 = arith.constant 0 : i32
    return %arg0, %arg1 : i32, i32
  }
}

</mosaic_0001>

<bundles_post_ra>
// kernel: tpu_custom_call.1
= control target key start
LH: loop header
LB: loop body
LE: loop exit
PB: predicated region body
PF: predicated region fallthrough
CT: control target
= control target key end

     0   :  { %9 = vsyncpa [#allocation4], 0  ;;  %s415_s0 = inlined_call_operand.hbm [shape: f32[16,128], index: 0, kind: input, shape index: {}]   ;;  %s416_s1 = inlined_call_operand.vmem [shape: f32[1,128], index: 1, kind: input, shape index: {}]   ;;  %s417_s2 = inlined_call_operand.hbm [shape: f32[128,128], index: 2, kind: input, shape index: {}]   ;;  %s418_s3 = inlined_call_operand.vmem [shape: f32[1,128], index: 3, kind: input, shape index: {}]   ;;  %s419_s4 = inlined_call_operand.hbm [shape: f32[16,128], index: 4, kind: output, shape index: {}]  }
   0x1   :  { %10 = vsyncpa [#allocation7], 0 }
   0x2   :  { %11 = vsyncpa [#allocation5], 0  ;;  %s349_s15 = smov [#allocation3]  }
   0x3   :  { %s17_s16 = sshll.u32 %s349_s15, 4  ;;  %s18_s16 = int_to_ptr.vmem [resolvable:$true] %s17_s16 }
   0x4   :  { %s291_s17 = scalar_lea.vmem %s18_s16, 256  ;;  %p296_p1 = scmp.lt.s32.totalorder %s18_s16, %s18_s16 }
   0x5   :  { %p292_p0 = scmp.ne.s32.totalorder %s18_s16, %s291_s17  ;;  %p297_p2 = scmp.lt.s32.totalorder %s291_s17, %s291_s17 }
   0x7   :  { %p298_p3 = por %p297_p2, %p296_p1 }
   0x9   :  { %p299_p4 = pnand %p298_p3, %p292_p0 }
   0xb   :  { %302 = shalt.err (!%p299_p4)
}
   0xc   :  { %s350_s18 = smov 128   ;;  %s351_s19 = smov 8  }
   0xd   :  { %23 = dma.hbm_to_vmem [thread:$0]  %s415_s0, 256, %s18_s16, [#allocation4], %s350_s18, %s350_s18, %s351_s19  }
   0xe   :  { %s352_s22 = smov [#allocation6]  }
   0xf   :  { %s31_s23 = sshll.u32 %s352_s22, 4  ;;  %s32_s23 = int_to_ptr.vmem [resolvable:$true] %s31_s23 }
  0x10   :  { %s311_s24 = scalar_lea.vmem %s32_s23, 2048  ;;  %p316_p6 = scmp.lt.s32.totalorder %s32_s23, %s32_s23 }
  0x11   :  { %p312_p5 = scmp.ne.s32.totalorder %s32_s23, %s311_s24  ;;  %p317_p7 = scmp.lt.s32.totalorder %s311_s24, %s311_s24 }
  0x13   :  { %p318_p8 = por %p317_p7, %p316_p6 }
  0x15   :  { %p319_p9 = pnand %p318_p8, %p312_p5 }
  0x17   :  { %322 = shalt.err (!%p319_p9)
}
  0x18   :  { %37 = dma.hbm_to_vmem [thread:$0]  %s417_s2, 2048, %s32_s23, [#allocation7], %s350_s18, %s350_s18, %s351_s19  }
  0x19   :  { %343 = dma.done.wait [#allocation4], 256  }
  0x1a   :  { %344 = vsyncadd [#allocation4], 4294967040 }
  0x1b   :  { %345 = dma.done.wait [#allocation7], 2048  }
  0x1c   :  { %346 = vsyncadd [#allocation7], 4294965248  ;;  %v391_v0 = vld [vmem:[#allocation3] sm:$0xff]  ;;  %v393_v1 = vld [vmem:[#allocation3 + $0x8] sm:$0xff]  ;;  %s353_s29 = smov [#allocation8]  }
  0x1d   :  { %v52_v2 = vmul.f32 %v391_v0, %v391_v0  ;;  %v53_v3 = vmul.f32 %v393_v1, %v393_v1  ;;  %v108_v4 = vld [vmem:[#allocation6 + $0x78] sm:$0xff]  ;;  %v107_v5 = vld [vmem:[#allocation6 + $0x70] sm:$0xff]  ;;  %v106_v6 = vld [vmem:[#allocation6 + $0x68] sm:$0xff]  ;;  %s202_s30 = sshll.u32 %s353_s29, 4  ;;  %s203_s30 = int_to_ptr.vmem [resolvable:$true] %s202_s30 }
  0x1e   :  { %235 = vmatprep.subr.mxu0 %v108_v4  ;;  %v105_v7 = vld [vmem:[#allocation6 + $0x60] sm:$0xff]  ;;  %v104_v8 = vld [vmem:[#allocation6 + $0x58] sm:$0xff]  ;;  %v103_v9 = vld [vmem:[#allocation6 + $0x50] sm:$0xff]  ;;  %p328_p11 = scmp.lt.s32.totalorder %s203_s30, %s203_s30 }
  0x1f   :  { %54 = vadd.xlane.f32.xlu0 %v52_v2  ;;  %236 = vmatpush3.msra.mxu0 %v108_v4  ;;  %v102_v10 = vld [vmem:[#allocation6 + $0x48] sm:$0xff]  ;;  %v101_v11 = vld [vmem:[#allocation6 + $0x40] sm:$0xff]  ;;  %v100_v12 = vld [vmem:[#allocation6 + $0x38] sm:$0xff] }
  0x20   :  { %237 = vmatprep.subr.mxu0 %v107_v5  ;;  %v99_v13 = vld [vmem:[#allocation6 + $0x30] sm:$0xff]  ;;  %v98_v14 = vld [vmem:[#allocation6 + $0x28] sm:$0xff]  ;;  %v97_v15 = vld [vmem:[#allocation6 + $0x20] sm:$0xff] }
  0x21   :  { %238 = vmatpush3.msra.mxu0 %v107_v5  ;;  %v96_v16 = vld [vmem:[#allocation6 + $0x18] sm:$0xff]  ;;  %v95_v17 = vld [vmem:[#allocation6 + $0x10] sm:$0xff]  ;;  %v94_v18 = vld [vmem:[#allocation6 + $0x8] sm:$0xff] }
  0x22   :  { %239 = vmatprep.subr.mxu0 %v106_v6  ;;  %v93_v19 = vld [vmem:[#allocation6] sm:$0xff]  ;;  %v215_v37 = vld [vmem:[%s416_s1] ss:$0 sm:$0xff]  ;;  %s323_s1 = scalar_lea.vmem %s203_s30, 256 }
  0x23   :  { %56 = vadd.xlane.f32.xlu0 %v53_v3  ;;  %240 = vmatpush3.msra.mxu0 %v106_v6  ;;  %v216_v43 = vld [vmem:[%s418_s3] ss:$0 sm:$0xff]  ;;  %p324_p10 = scmp.ne.s32.totalorder %s203_s30, %s323_s1  ;;  %p329_p12 = scmp.lt.s32.totalorder %s323_s1, %s323_s1 }
  0x24   :  { %241 = vmatprep.subr.mxu0 %v105_v7 }
  0x25   :  { %242 = vmatpush3.msra.mxu0 %v105_v7  ;;  %p330_p13 = por %p329_p12, %p328_p11 }
  0x26   :  { %243 = vmatprep.subr.mxu0 %v104_v8 }
  0x27   :  { %244 = vmatpush3.msra.mxu0 %v104_v8  ;;  %p331_p0 = pnand %p330_p13, %p324_p10 }
  0x28   :  { %245 = vmatprep.subr.mxu0 %v103_v9 }
  0x29   :  { %246 = vmatpush3.msra.mxu0 %v103_v9 }
  0x2a   :  { %247 = vmatprep.subr.mxu0 %v102_v10 }
  0x2b   :  { %248 = vmatpush3.msra.mxu0 %v102_v10 }
  0x2c   :  { %249 = vmatprep.subr.mxu0 %v101_v11 }
  0x2d   :  { %250 = vmatpush3.msra.mxu0 %v101_v11 }
  0x2e   :  { %251 = vmatprep.subr.mxu0 %v100_v12 }
  0x2f   :  { %252 = vmatpush3.msra.mxu0 %v100_v12 }
  0x30   :  { %253 = vmatprep.subr.mxu0 %v99_v13 }
  0x31   :  { %254 = vmatpush3.msra.mxu0 %v99_v13 }
  0x32   :  { %255 = vmatprep.subr.mxu0 %v98_v14 }
  0x33   :  { %256 = vmatpush3.msra.mxu0 %v98_v14 }
  0x34   :  { %257 = vmatprep.subr.mxu0 %v97_v15 }
  0x35   :  { %258 = vmatpush3.msra.mxu0 %v97_v15 }
  0x36   :  { %259 = vmatprep.subr.mxu0 %v96_v16 }
  0x37   :  { %260 = vmatpush3.msra.mxu0 %v96_v16 }
  0x38   :  { %261 = vmatprep.subr.mxu0 %v95_v17 }
  0x39   :  { %262 = vmatpush3.msra.mxu0 %v95_v17 }
  0x3a   :  { %263 = vmatprep.subr.mxu0 %v94_v18 }
  0x3b   :  { %264 = vmatpush3.msra.mxu0 %v94_v18 }
  0x3c   :  { %265 = vmatprep.subr.mxu0 %v93_v19 }
  0x3d   :  { %266 = vmatpush3.msra.mxu0 %v93_v19 }
  0xa8   :  { %v55_v20 = vpop.xlane.xlu0 %54 }
  0xa9   :  { %275 = vrsqrt.f32 %v55_v20  ;;  %vm60_vm0 = vcmp.eq.f32.partialorder %v55_v20, inf  ;;  %v63_v24 = vand.u32 2147483648, %v55_v20  ;;  %vm62_vm1 = vcmp.eq.f32.partialorder %v55_v20, 0.0 }
  0xac   :  { %v57_v21 = vpop.xlane.xlu0 %56 }
  0xad   :  { %277 = vrsqrt.f32 %v57_v21  ;;  %vm67_vm2 = vcmp.eq.f32.partialorder %v57_v21, inf  ;;  %v70_v30 = vand.u32 2147483648, %v57_v21  ;;  %vm69_vm3 = vcmp.eq.f32.partialorder %v57_v21, 0.0 }
  0xb6   :  { %v276_v22 = vpop.eup %275 }
  0xb7   :  { %v59_v23 = vmul.f32 %v276_v22, %v55_v20 }
  0xb9   :  { %v61_v25 = vsel %vm60_vm0, %v55_v20, %v59_v23 }
  0xba   :  { %v278_v26 = vpop.eup %277  ;;  %v64_v27 = vsel %vm62_vm1, %v63_v24, %v61_v25 }
  0xbb   :  { %v72_v28 = vmul.f32 0.17677669, %v64_v27  ;;  %v66_v29 = vmul.f32 %v278_v26, %v57_v21 }
  0xbd   :  { %v74_v31 = vadd.f32 1e-08, %v72_v28  ;;  %v68_v32 = vsel %vm67_vm2, %v57_v21, %v66_v29 }
  0xbe   :  { %v71_v33 = vsel %vm69_vm3, %v70_v30, %v68_v32 }
  0xbf   :  { %279 = vrcp.f32 %v74_v31  ;;  %v73_v34 = vmul.f32 0.17677669, %v71_v33 }
  0xc1   :  { %v75_v35 = vadd.f32 1e-08, %v73_v34 }
  0xc3   :  { %281 = vrcp.f32 %v75_v35 }
  0xcc   :  { %v280_v36 = vpop.eup %279 }
  0xcd   :  { %v78_v38 = vmul.f32 %v280_v36, %v391_v0 }
  0xcf   :  { %v87_v39 = vmul.f32 %v215_v37, %v78_v38 }
  0xd0   :  { %v282_v40 = vpop.eup %281 }
  0xd1   :  { %v79_v41 = vmul.f32 %v282_v40, %v393_v1  ;;  %267 = vmatprep.mubr.f32.mxu0 %v87_v39 }
  0xd3   :  { %v88_v42 = vmul.f32 %v215_v37, %v79_v41 }
  0xd5   :  { %268 = vmatmul.mubr.f32.vlgmr.msra.gmra.mxu0 %v88_v42 }
 0x195   :  { %v269_v44 = vpop.f32.mrf.mxu0 }
 0x196   :  { %v188_v45 = vadd.f32 %v269_v44, %v216_v43 }
 0x197   :  { %v182_v46 = vpop.f32.mrf.mxu0 }
 0x198   :  { %v194_v47 = vadd.f32 %v188_v45, %v393_v1  ;;  %v183_v48 = vadd.f32 %v216_v43, %v182_v46 }
 0x19a   :  { %196 = vst [vmem:[#allocation8 + $0x8] sm:$0xff] %v194_v47  ;;  %v193_v49 = vadd.f32 %v183_v48, %v391_v0 }
 0x19c   :  { %195 = vst [vmem:[#allocation8] sm:$0xff] %v193_v49 }
 0x19d   :  { %334 = shalt.err (!%p331_p0)
}
 0x19e   :  { %208 = dma.vmem_to_hbm [thread:$0]  %s203_s30, 256, %s419_s4, [#allocation5], %s350_s18, %s350_s18, %s351_s19  }
 0x19f   :  { %347 = dma.done.wait [#allocation5], 256  }
 0x1a0   :  { %348 = vsyncadd [#allocation5], 4294967040 }
 0x1a1   :  { %212 = vsyncpa [#allocation4], 1 }
 0x1a2   :  { %213 = vsyncpa [#allocation7], 1 }
 0x1a3   :  { %214 = vsyncpa [#allocation5], 1 }

</bundles_post_ra>
